<compile_context>
chip_gen: v7x
topology: tpu7x:2x2x1
jax: 0.10.0
libtpu: 0.0.40
codegen_flags: <defaults>
</compile_context>

<pallas_src>
import jax
import jax.numpy as jnp
from jax.experimental import pallas as pl
from jax.experimental.pallas import tpu as pltpu


def _round_up(n, m):
    return ((n + m - 1) // m) * m


def _cdiv(a, b):
    return (a + b - 1) // b


def _default_fc1_dtype():
    """bf16 fc1 on chips with bf16-capable VALUs (v6e, v7x); f32 elsewhere (v5e)."""
    kind = jax.devices()[0].device_kind.lower()
    return jnp.bfloat16 if ("v6" in kind or "v7" in kind) else jnp.float32


def _choose_tiling(batch, tm_cap):
    """Pick (TM, padded_batch): TM a multiple of 128, TM <= ~tm_cap, and total
    tail padding < 128 columns per grid step (minimizes dead fc1/fc2 work)."""
    b128 = _round_up(max(batch, 1), 128)
    cap = max(128, _round_up(tm_cap, 128))
    if b128 <= cap:
        return b128, b128                       # single tile, minimal padding
    steps = _cdiv(b128, cap)
    tm = _round_up(_cdiv(b128, steps), 128)
    return tm, tm * steps


def munet_kernel(xt_ref, w1t_ref, b1_ref, w2t_ref, b2_ref, w3_ref, b3_ref, o_ref):
    # fc1 + ReLU on the VPU.  K=3 would fill only 3 MXU rows, so three broadcast
    # FMAs over the (128, TM) tile are cheaper and keep the MXU free.  The chain
    # runs in the fc1 dtype chosen by the wrapper (bf16 on v6e/v7x -> packed
    # vregs, h1 already bf16 for the MXU; f32 on v5e).  Mosaic fuses the
    # elementwise chain; the broadcasts of the tiny (128,1)/(1,TM) operands are
    # hoisted per lane-block by the compiler.
    h1 = w1t_ref[:, 0:1] * xt_ref[0:1, :]
    h1 = h1 + w1t_ref[:, 1:2] * xt_ref[1:2, :]
    h1 = h1 + w1t_ref[:, 2:3] * xt_ref[2:3, :]
    h1 = jnp.maximum(h1 + b1_ref[...], 0)                         # (128, TM)

    # fc2 + ReLU: MXU matmul, bf16 operands, f32 accumulation; bias add in f32.
    h2 = jnp.dot(w2t_ref[...], h1.astype(jnp.bfloat16),
                 preferred_element_type=jnp.float32)               # (64, TM) f32
    h2 = jnp.maximum(h2 + b2_ref[...], 0.0)

    # fc_mu + tanh*2: N=1, so a VPU multiply + sublane reduce beats another MXU
    # round trip.  b3 comes from SMEM (no lane-padded VMEM block needed).
    mu = jnp.sum(h2 * w3_ref[...], axis=0, keepdims=True) + b3_ref[0]   # (1, TM)
    o_ref[...] = (jnp.tanh(mu) * 2.0).astype(o_ref.dtype)


def _prepare_kernel_params(params, fc1_dtype):
    """Cast torch-layout params to kernel layout (cheap; reuse across calls)."""
    w1, b1, w2, b2, w3, b3 = params
    return (
        jnp.asarray(w1, fc1_dtype),                     # (128, 3)
        jnp.asarray(b1, fc1_dtype).reshape(-1, 1),      # (128, 1)
        jnp.asarray(w2, jnp.bfloat16),                  # (64, 128)  MXU operand
        jnp.asarray(b2, jnp.float32).reshape(-1, 1),    # (64, 1)
        jnp.asarray(w3, jnp.float32).reshape(-1, 1),    # (64, 1)
        jnp.asarray(b3, jnp.float32).reshape(-1),       # (1,)  -> SMEM scalar
    )


def _munet_pallas(xt, kparams, tm):
    """xt: (3, Bp) with Bp % tm == 0, dtype = fc1 compute dtype.  Returns (1, Bp) f32."""
    w1t, b1c, w2t, b2c, w3c, b3s = kparams
    bp = xt.shape[1]
    grid = (bp // tm,)

    def const_spec(a):
        # Grid-invariant block: constant index_map => loaded once, VMEM-resident.
        return pl.BlockSpec(a.shape, lambda i: (0, 0))

    def build(dim_sems):
        return pl.pallas_call(
            munet_kernel,
            out_shape=jax.ShapeDtypeStruct((1, bp), jnp.float32),
            grid=grid,
            in_specs=[
                pl.BlockSpec((3, tm), lambda i: (0, i)),               # streamed x
                const_spec(w1t), const_spec(b1c),
                const_spec(w2t), const_spec(b2c),
                const_spec(w3c),
                pl.BlockSpec(memory_space=pltpu.MemorySpace.SMEM),     # b3 scalar
            ],
            out_specs=pl.BlockSpec((1, tm), lambda i: (0, i)),         # lane-dense
            compiler_params=pltpu.CompilerParams(
                dimension_semantics=dim_sems,
                # Headroom for big f32 tiles beyond v5e's small scoped default;
                # still comfortably under v7x's 64 MiB physical VMEM.
                vmem_limit_bytes=48 * 1024 * 1024,
            ),
        )

    args = (xt, w1t, b1c, w2t, b2c, w3c, b3s)
    kind = jax.devices()[0].device_kind.lower()
    if "v7" in kind and grid[0] >= 2:
        # v7x has 2 TensorCores: actually split the batch grid across them.
        try:
            return build((pltpu.CORE_PARALLEL,))(*args)
        except Exception:
            pass  # portable fallback below
    return build((pltpu.PARALLEL,))(*args)


def munet_forward_feature_major(xt, params, *, tm=8192, fc1_dtype=None):
    """MuNet forward on feature-major activations.

    xt: (3, B) array, batch on the last (lane) axis.  Returns (1, B) float32.
    Hot-path entry point: avoids the host-side (B,3) -> (3,B) transpose that
    `munet_forward` performs (which for large B costs more HBM traffic than the
    kernel itself).
    """
    if fc1_dtype is None:
        fc1_dtype = _default_fc1_dtype()
    b = xt.shape[1]
    tm_, bp = _choose_tiling(b, tm)
    if bp != b:
        xt = jnp.pad(xt, ((0, 0), (0, bp - b)))
    out = _munet_pallas(xt.astype(fc1_dtype),
                        _prepare_kernel_params(params, fc1_dtype), tm_)
    return out[:, :b]


def munet_forward(x, params, *, tm=8192, fc1_dtype=None):
    """MuNet forward, torch-style interface.  x: (B, 3).  Returns (B, 1) float32."""
    b = x.shape[0]
    out = munet_forward_feature_major(x.T, params, tm=tm, fc1_dtype=fc1_dtype)
    return out[0, :].reshape(b, 1)


def init_params(key):
    """Torch-default Linear init: U(-1/sqrt(fan_in), +1/sqrt(fan_in)).
    Weights stored in torch layout (out_features, in_features)."""
    def linear(k, fan_in, fan_out):
        kw, kb = jax.random.split(k)
        bound = 1.0 / jnp.sqrt(jnp.float32(fan_in))
        w = jax.random.uniform(kw, (fan_out, fan_in), jnp.float32, -bound, bound)
        b = jax.random.uniform(kb, (fan_out,), jnp.float32, -bound, bound)
        return w, b

    k1, k2, k3 = jax.random.split(key, 3)
    w1, b1 = linear(k1, 3, 128)
    w2, b2 = linear(k2, 128, 64)
    w3, b3 = linear(k3, 64, 1)
    return (w1, b1, w2, b2, w3, b3)


def munet_reference_f32(x, params):
    """Pure-JAX f32 reference of the PyTorch forward."""
    w1, b1, w2, b2, w3, b3 = params
    h1 = jax.nn.relu(x @ w1.T + b1)
    h2 = jax.nn.relu(h1 @ w2.T + b2)
    return jnp.tanh(h2 @ w3.T + b3) * 2.0


def munet_reference_matched(x, params, fc1_dtype=jnp.float32):
    """Reference approximating the kernel's numerics: fc1 in `fc1_dtype`,
    fc2 with bf16 operands and f32 accumulation."""
    w1, b1, w2, b2, w3, b3 = params
    h1 = jnp.maximum(
        jnp.dot(x.astype(fc1_dtype), w1.T.astype(fc1_dtype)) + b1.astype(fc1_dtype),
        0).astype(jnp.float32)
    h2 = jnp.maximum(
        jnp.dot(h1.astype(jnp.bfloat16), w2.T.astype(jnp.bfloat16),
                preferred_element_type=jnp.float32) + b2, 0.0)
    return jnp.tanh(h2 @ w3.T + b3) * 2.0


if __name__ == "__main__":
    key = jax.random.PRNGKey(0)
    k_params, k_x1, k_x2 = jax.random.split(key, 3)
    params = init_params(k_params)

    # Small Pendulum-style batch — f32 fc1 path, tight-tolerance validation.
    B = 8
    x = jax.random.normal(k_x1, (B, 3), jnp.float32)
    out_f32 = jax.block_until_ready(munet_forward(x, params, fc1_dtype=jnp.float32))
    assert out_f32.shape == (B, 1)
    assert jnp.allclose(out_f32, munet_reference_matched(x, params, jnp.float32), atol=5e-3)
    assert jnp.allclose(out_f32, munet_reference_f32(x, params), atol=3e-2)

    # Same batch on the auto (per-generation) fc1 path: bf16 on v6e/v7x, f32 on v5e.
    fc1_dt = _default_fc1_dtype()
    out_auto = jax.block_until_ready(munet_forward(x, params))
    assert out_auto.shape == (B, 1)
    assert jnp.allclose(out_auto, munet_reference_matched(x, params, fc1_dt), atol=5e-2)
    assert jnp.allclose(out_auto, munet_reference_f32(x, params), atol=1e-1)

    # Feature-major hot-path entry point matches the torch-style wrapper.
    out_fm = jax.block_until_ready(munet_forward_feature_major(x.T, params))
    assert jnp.allclose(out_fm.reshape(B, 1), out_auto)

    # Larger, non-tile-multiple batch: >1-step grid, VMEM-resident weights across
    # steps, minimal-tail tiling (1000 -> Bp=1024, TM=512, grid=(2,)).
    B2 = 1000
    x2 = jax.random.normal(k_x2, (B2, 3), jnp.float32)
    out2 = jax.block_until_ready(munet_forward(x2, params, tm=512, fc1_dtype=jnp.float32))
    assert out2.shape == (B2, 1)
    assert jnp.allclose(out2, munet_reference_matched(x2, params, jnp.float32), atol=5e-3)
    assert jnp.allclose(out2, munet_reference_f32(x2, params), atol=3e-2)

    out2_auto = jax.block_until_ready(munet_forward(x2, params, tm=512))
    assert out2_auto.shape == (B2, 1)
    assert jnp.allclose(out2_auto, munet_reference_f32(x2, params), atol=1e-1)

    print("KERNEL_OK")
</pallas_src>

<mosaic_0001>
module attributes {stable_mosaic.version = 11 : i64} {
  func.func @munet_kernel(%arg0: i32, %arg1: memref<3x128xf32, #tpu.memory_space<vmem>>, %arg2: memref<128x3xf32, #tpu.memory_space<vmem>>, %arg3: memref<128x1xf32, #tpu.memory_space<vmem>>, %arg4: memref<64x128xbf16, #tpu.memory_space<vmem>>, %arg5: memref<64x1xf32, #tpu.memory_space<vmem>>, %arg6: memref<64x1xf32, #tpu.memory_space<vmem>>, %arg7: memref<1xf32, #tpu.memory_space<smem>>, %arg8: memref<1x128xf32, #tpu.memory_space<vmem>>) attributes {dimension_semantics = [#tpu.dimension_semantics<parallel>], iteration_bounds = array<i64: 1>, scalar_prefetch = 0 : i64, scratch_operands = 0 : i64, tpu.core_type = #tpu.core_type<tc>, window_params = [{transform_indices = @transform_0, window_bounds = array<i64: 3, 128>}, {pipeline_mode = #tpu.pipeline_mode<synchronous>, transform_indices = @transform_1, window_bounds = array<i64: 128, 3>}, {pipeline_mode = #tpu.pipeline_mode<synchronous>, transform_indices = @transform_2, window_bounds = array<i64: 128, 1>}, {pipeline_mode = #tpu.pipeline_mode<synchronous>, transform_indices = @transform_3, window_bounds = array<i64: 64, 128>}, {pipeline_mode = #tpu.pipeline_mode<synchronous>, transform_indices = @transform_4, window_bounds = array<i64: 64, 1>}, {pipeline_mode = #tpu.pipeline_mode<synchronous>, transform_indices = @transform_5, window_bounds = array<i64: 64, 1>}, {transform_indices = @transform_6, window_bounds = array<i64: 1>}, {transform_indices = @transform_7, window_bounds = array<i64: 1, 128>}]} {
    %c0 = arith.constant 0 : index
    %c0_0 = arith.constant 0 : index
    %0 = vector.load %arg2[%c0, %c0_0] : memref<128x3xf32, #tpu.memory_space<vmem>>, vector<128x1xf32>
    %c0_1 = arith.constant 0 : index
    %c0_2 = arith.constant 0 : index
    %1 = vector.load %arg1[%c0_1, %c0_2] : memref<3x128xf32, #tpu.memory_space<vmem>>, vector<1x128xf32>
    %2 = vector.broadcast %0 : vector<128x1xf32> to vector<128x128xf32>
    %3 = vector.broadcast %1 : vector<1x128xf32> to vector<128x128xf32>
    %4 = arith.mulf %2, %3 : vector<128x128xf32>
    %c0_3 = arith.constant 0 : index
    %c1 = arith.constant 1 : index
    %5 = vector.load %arg2[%c0_3, %c1] : memref<128x3xf32, #tpu.memory_space<vmem>>, vector<128x1xf32>
    %c1_4 = arith.constant 1 : index
    %c0_5 = arith.constant 0 : index
    %6 = vector.load %arg1[%c1_4, %c0_5] : memref<3x128xf32, #tpu.memory_space<vmem>>, vector<1x128xf32>
    %7 = vector.broadcast %5 : vector<128x1xf32> to vector<128x128xf32>
    %8 = vector.broadcast %6 : vector<1x128xf32> to vector<128x128xf32>
    %9 = arith.mulf %7, %8 : vector<128x128xf32>
    %10 = arith.addf %4, %9 : vector<128x128xf32>
    %c0_6 = arith.constant 0 : index
    %c2 = arith.constant 2 : index
    %11 = vector.load %arg2[%c0_6, %c2] : memref<128x3xf32, #tpu.memory_space<vmem>>, vector<128x1xf32>
    %c2_7 = arith.constant 2 : index
    %c0_8 = arith.constant 0 : index
    %12 = vector.load %arg1[%c2_7, %c0_8] : memref<3x128xf32, #tpu.memory_space<vmem>>, vector<1x128xf32>
    %13 = vector.broadcast %11 : vector<128x1xf32> to vector<128x128xf32>
    %14 = vector.broadcast %12 : vector<1x128xf32> to vector<128x128xf32>
    %15 = arith.mulf %13, %14 : vector<128x128xf32>
    %16 = arith.addf %10, %15 : vector<128x128xf32>
    %c0_9 = arith.constant 0 : index
    %c0_10 = arith.constant 0 : index
    %17 = vector.load %arg3[%c0_9, %c0_10] : memref<128x1xf32, #tpu.memory_space<vmem>>, vector<128x1xf32>
    %18 = vector.broadcast %17 : vector<128x1xf32> to vector<128x128xf32>
    %19 = arith.addf %16, %18 : vector<128x128xf32>
    %cst = arith.constant 0.000000e+00 : f32
    %20 = vector.broadcast %cst : f32 to vector<128x128xf32>
    %21 = arith.maximumf %19, %20 : vector<128x128xf32>
    %c0_11 = arith.constant 0 : index
    %c0_12 = arith.constant 0 : index
    %22 = vector.load %arg4[%c0_11, %c0_12] : memref<64x128xbf16, #tpu.memory_space<vmem>>, vector<64x128xbf16>
    %23 = arith.truncf %21 : vector<128x128xf32> to vector<128x128xbf16>
    %cst_13 = arith.constant dense<0.000000e+00> : vector<64x128xf32>
    %24 = tpu.matmul %22, %23, %cst_13 {dimension_numbers = #tpu.dot_dimension_numbers<[1], [0], [0], [1], [0, 0, 1, 1], [], []>} : vector<64x128xbf16>, vector<128x128xbf16>, vector<64x128xf32> -> vector<64x128xf32>
    %c0_14 = arith.constant 0 : index
    %c0_15 = arith.constant 0 : index
    %25 = vector.load %arg5[%c0_14, %c0_15] : memref<64x1xf32, #tpu.memory_space<vmem>>, vector<64x1xf32>
    %26 = vector.broadcast %25 : vector<64x1xf32> to vector<64x128xf32>
    %27 = arith.addf %24, %26 : vector<64x128xf32>
    %cst_16 = arith.constant 0.000000e+00 : f32
    %28 = vector.broadcast %cst_16 : f32 to vector<64x128xf32>
    %29 = arith.maximumf %27, %28 : vector<64x128xf32>
    %c0_17 = arith.constant 0 : index
    %c0_18 = arith.constant 0 : index
    %30 = vector.load %arg6[%c0_17, %c0_18] : memref<64x1xf32, #tpu.memory_space<vmem>>, vector<64x1xf32>
    %31 = vector.broadcast %30 : vector<64x1xf32> to vector<64x128xf32>
    %32 = arith.mulf %29, %31 : vector<64x128xf32>
    %cst_19 = arith.constant dense<0.000000e+00> : vector<128xf32>
    %33 = vector.multi_reduction <add>, %32, %cst_19 [0] : vector<64x128xf32> to vector<128xf32>
    %34 = vector.shape_cast %33 : vector<128xf32> to vector<1x128xf32>
    %c0_20 = arith.constant 0 : index
    %35 = memref.load %arg7[%c0_20] : memref<1xf32, #tpu.memory_space<smem>>
    %36 = vector.broadcast %35 : f32 to vector<1x128xf32>
    %37 = arith.addf %34, %36 : vector<1x128xf32>
    %38 = math.tanh %37 : vector<1x128xf32>
    %cst_21 = arith.constant 2.000000e+00 : f32
    %39 = vector.broadcast %cst_21 : f32 to vector<1x128xf32>
    %40 = arith.mulf %38, %39 : vector<1x128xf32>
    %c0_22 = arith.constant 0 : index
    %c0_23 = arith.constant 0 : index
    %41 = vector.load %arg8[%c0_22, %c0_23] : memref<1x128xf32, #tpu.memory_space<vmem>>, vector<1x128xf32>
    tpu.vector_store %arg8[%c0_22, %c0_23], %40 {strides = array<i32>} : memref<1x128xf32, #tpu.memory_space<vmem>>, vector<1x128xf32>,
    return
  }
  func.func @transform_0(%arg0: i32) -> (i32, i32) {
    %c0_i32 = arith.constant 0 : i32
    %c0_i32_0 = arith.constant 0 : i32
    return %c0_i32, %arg0 : i32, i32
  }
  func.func @transform_1(%arg0: i32) -> (i32, i32) {
    %c0_i32 = arith.constant 0 : i32
    %c0_i32_0 = arith.constant 0 : i32
    %c0_i32_1 = arith.constant 0 : i32
    return %c0_i32, %c0_i32_0 : i32, i32
  }
  func.func @transform_2(%arg0: i32) -> (i32, i32) {
    %c0_i32 = arith.constant 0 : i32
    %c0_i32_0 = arith.constant 0 : i32
    %c0_i32_1 = arith.constant 0 : i32
    return %c0_i32, %c0_i32_0 : i32, i32
  }
  func.func @transform_3(%arg0: i32) -> (i32, i32) {
    %c0_i32 = arith.constant 0 : i32
    %c0_i32_0 = arith.constant 0 : i32
    %c0_i32_1 = arith.constant 0 : i32
    return %c0_i32, %c0_i32_0 : i32, i32
  }
  func.func @transform_4(%arg0: i32) -> (i32, i32) {
    %c0_i32 = arith.constant 0 : i32
    %c0_i32_0 = arith.constant 0 : i32
    %c0_i32_1 = arith.constant 0 : i32
    return %c0_i32, %c0_i32_0 : i32, i32
  }
  func.func @transform_5(%arg0: i32) -> (i32, i32) {
    %c0_i32 = arith.constant 0 : i32
    %c0_i32_0 = arith.constant 0 : i32
    %c0_i32_1 = arith.constant 0 : i32
    return %c0_i32, %c0_i32_0 : i32, i32
  }
  func.func @transform_6(%arg0: i32) -> i32 {
    %c0_i32 = arith.constant 0 : i32
    %c0_i32_0 = arith.constant 0 : i32
    return %c0_i32 : i32
  }
  func.func @transform_7(%arg0: i32) -> (i32, i32) {
    %c0_i32 = arith.constant 0 : i32
    %c0_i32_0 = arith.constant 0 : i32
    return %c0_i32, %arg0 : i32, i32
  }
}

</mosaic_0001>

<bundles_post_ra>
// kernel: tpu_custom_call.1
= control target key start
LH: loop header
LB: loop body
LE: loop exit
PB: predicated region body
PF: predicated region fallthrough
CT: control target
= control target key end

     0   :  { %v846_v1 = vmov 2   ;;  %v847_v2 = vmov 1   ;;  %v848_v7 = vmov 0   ;;  %s1198_s0 = inlined_call_operand.vmem [shape: f32[3,128], index: 0, kind: input, shape index: {}]   ;;  %s1199_s1 = inlined_call_operand.vmem [shape: f32[128,3], index: 1, kind: input, shape index: {}]   ;;  %s1200_s2 = inlined_call_operand.vmem [shape: f32[128,1], index: 2, kind: input, shape index: {}]   ;;  %s1201_s3 = inlined_call_operand.vmem [shape: bf16[64,128], index: 3, kind: input, shape index: {}]   ;;  %s1202_s4 = inlined_call_operand.vmem [shape: f32[64,1], index: 4, kind: input, shape index: {}]   ;;  %s1203_s5 = inlined_call_operand.vmem [shape: f32[64,1], index: 5, kind: input, shape index: {}]   ;;  %s1204_s6 = inlined_call_operand.<no memory space> [shape: f32[1], index: 6, kind: input, shape index: {}]   ;;  %s1205_s7 = inlined_call_operand.hbm [shape: f32[1,128], index: 7, kind: output, shape index: {}]  }
   0x1   :  { %v29_v0 = vld [vmem:[%s1199_s1] sm:$0xff]  ;;  %790 = vset.pattern.permute.xlu0 %v846_v1  ;;  %789 = vset.pattern.permute.xlu1 %v847_v2  ;;  %v31_v3 = vld [vmem:[%s1199_s1 + $0x10] sm:$0xff]  ;;  %v30_v4 = vld [vmem:[%s1199_s1 + $0x8] sm:$0xff] }
   0x2   :  { %249 = vperm.xlu0 %790, %v29_v0   ;;  %148 = vperm.xlu1 %789, %v29_v0   ;;  %v34_v5 = vld [vmem:[%s1199_s1 + $0x28] sm:$0xff]  ;;  %v33_v6 = vld [vmem:[%s1199_s1 + $0x20] sm:$0xff] }
   0x6   :  { %257 = vperm.xlu0 %790, %v31_v3   ;;  %152 = vperm.xlu1 %789, %v30_v4  }
   0xa   :  { %269 = vperm.xlu0 %790, %v34_v5   ;;  %791 = vset.pattern.permute.xlu1 %v846_v1 }
   0xb   :  { %253 = vperm.xlu1 %791, %v30_v4  }
   0xe   :  { %798 = vset.pattern.permute.xlu0 %v847_v2 }
   0xf   :  { %164 = vperm.xlu0 %798, %v33_v6   ;;  %792 = vset.pattern.permute.xlu1 %v848_v7 }
  0x10   :  { %13 = vsyncpa [#allocation4], 0  ;;  %58 = vperm.xlu1 %792, %v31_v3   ;;  %v36_v8 = vld [vmem:[%s1199_s1 + $0x38] sm:$0xff]  ;;  %v917_v9 = vld [vmem:[%s1199_s1 + $0x48] sm:$0xff]  ;;  %s849_s14 = smov [#allocation3]  }
  0x11   :  { %v32_v10 = vld [vmem:[%s1199_s1 + $0x18] sm:$0xff]  ;;  %v932_v12 = vld [vmem:[%s1199_s1 + $0x68] sm:$0xff]  ;;  %v348_v14 = vld [vmem:[%s1200_s2] sm:$0xff] }
  0x12   :  { %v926_v11 = vld [vmem:[%s1199_s1 + $0x58] sm:$0xff]  ;;  %v349_v15 = vld [vmem:[%s1200_s2 + $0x8] sm:$0xff]  ;;  %v35_v16 = vld [vmem:[%s1199_s1 + $0x30] sm:$0xff] }
  0x13   :  { %176 = vperm.xlu0 %798, %v36_v8   ;;  %v939_v13 = vld [vmem:[%s1199_s1 + $0x78] sm:$0xff]  ;;  %v350_v17 = vld [vmem:[%s1200_s2 + $0x10] sm:$0xff]  ;;  %v352_v18 = vld [vmem:[%s1200_s2 + $0x20] sm:$0xff] }
  0x14   :  { %793 = vset.pattern.permute.xlu1 %v847_v2  ;;  %v351_v19 = vld [vmem:[%s1200_s2 + $0x18] sm:$0xff]  ;;  %v354_v20 = vld [vmem:[%s1200_s2 + $0x30] sm:$0xff]  ;;  %v356_v21 = vld [vmem:[%s1200_s2 + $0x40] sm:$0xff] }
  0x15   :  { %156 = vperm.xlu1 %793, %v31_v3   ;;  %v358_v22 = vld [vmem:[%s1200_s2 + $0x50] sm:$0xff]  ;;  %v353_v23 = vld [vmem:[%s1200_s2 + $0x28] sm:$0xff]  ;;  %v37_v24 = vld [vmem:[%s1199_s1 + $0x40] sm:$0xff] }
  0x16   :  { %v360_v25 = vld [vmem:[%s1200_s2 + $0x60] sm:$0xff]  ;;  %v363_v26 = vld [vmem:[%s1200_s2 + $0x78] sm:$0xff]  ;;  %v493_v27 = vld [vmem:[%s1202_s4 + $0x8] sm:$0xff] }
  0x17   :  { %184 = vperm.xlu0 %798, %v917_v9   ;;  %v495_v28 = vld [vmem:[%s1202_s4 + $0x18] sm:$0xff]  ;;  %v638_v29 = vld [vmem:[%s1203_s5 + $0x8] sm:$0xff]  ;;  %v639_v31 = vld [vmem:[%s1203_s5 + $0x10] sm:$0xff] }
  0x18   :  { %v355_v30 = vld [vmem:[%s1200_s2 + $0x38] sm:$0xff]  ;;  %v39_v32 = vld [vmem:[%s1199_s1 + $0x50] sm:$0xff]  ;;  %v641_v34 = vld [vmem:[%s1203_s5 + $0x20] sm:$0xff] }
  0x19   :  { %160 = vperm.xlu1 %793, %v32_v10   ;;  %v640_v33 = vld [vmem:[%s1203_s5 + $0x18] sm:$0xff]  ;;  %v642_v35 = vld [vmem:[%s1203_s5 + $0x28] sm:$0xff]  ;;  %v41_v40 = vld [vmem:[%s1199_s1 + $0x60] sm:$0xff] }
  0x1a   :  { %v644_v36 = vld [vmem:[%s1203_s5 + $0x38] sm:$0xff]  ;;  %v357_v37 = vld [vmem:[%s1200_s2 + $0x48] sm:$0xff]  ;;  %v43_v53 = vld [vmem:[%s1199_s1 + $0x70] sm:$0xff] }
  0x1b   :  { %192 = vperm.xlu0 %798, %v926_v11   ;;  %v359_v50 = vld [vmem:[%s1200_s2 + $0x58] sm:$0xff]  ;;  %v1065_v58 = vld [vmem:[%s1198_s0 + $0x1] ss:$0 sm:$0xff]  ;;  %v1072_v60 = vld [vmem:[%s1198_s0] ss:$0 sm:$0xff] }
  0x1d   :  { %794 = vset.pattern.permute.xlu1 %v846_v1 }
  0x1e   :  { %261 = vperm.xlu1 %794, %v32_v10  }
  0x1f   :  { %200 = vperm.xlu0 %798, %v932_v12  }
  0x22   :  { %795 = vset.pattern.permute.xlu1 %v848_v7 }
  0x23   :  { %208 = vperm.xlu0 %798, %v939_v13   ;;  %366 = vperm.xlu1 %795, %v348_v14  }
  0x27   :  { %813 = vset.pattern.permute.xlu0 %v848_v7  ;;  %68 = vperm.xlu1 %795, %v33_v6  }
  0x28   :  { %48 = vperm.xlu0 %813, %v29_v0   ;;  %v1080_v0 = vld [vmem:[%s1198_s0 + $0x2] ss:$0 sm:$0xff]  ;;  %s718_s0 = sshll.u32 %s849_s14, 4  ;;  %s719_s0 = int_to_ptr.vmem [resolvable:$true] %s718_s0 }
  0x29   :  { %s822_s15 = scalar_lea.vmem %s719_s0, 16  ;;  %s826_s16 = scalar_lea.vmem %s719_s0, 32 }
  0x2a   :  { %p823_p0 = scmp.ne.s32.totalorder %s719_s0, %s822_s15  ;;  %p827_p1 = scmp.lt.s32.totalorder %s719_s0, %s719_s0 }
  0x2b   :  { %73 = vperm.xlu1 %795, %v34_v5   ;;  %p828_p2 = scmp.lt.s32.totalorder %s826_s16, %s822_s15 }
  0x2c   :  { %53 = vperm.xlu0 %813, %v30_v4  }
  0x2d   :  { %p829_p3 = por %p828_p2, %p827_p1 }
  0x2f   :  { %796 = vset.pattern.permute.xlu1 %v847_v2  ;;  %p830_p4 = pnand %p829_p3, %p823_p0 }
  0x30   :  { %63 = vperm.xlu0 %813, %v32_v10   ;;  %168 = vperm.xlu1 %796, %v34_v5   ;;  %v361_v10 = vld [vmem:[%s1200_s2 + $0x68] sm:$0xff] }
  0x34   :  { %371 = vperm.xlu0 %813, %v349_v15   ;;  %797 = vset.pattern.permute.xlu1 %v846_v1 }
  0x35   :  { %265 = vperm.xlu1 %797, %v33_v6  }
  0x38   :  { %78 = vperm.xlu0 %813, %v35_v16  }
  0x39   :  { %799 = vset.pattern.permute.xlu1 %v848_v7 }
  0x3a   :  { %376 = vperm.xlu1 %799, %v350_v17  }
  0x3c   :  { %386 = vperm.xlu0 %813, %v352_v18  }
  0x3e   :  { %381 = vperm.xlu1 %799, %v351_v19  }
  0x40   :  { %93 = vperm.xlu0 %813, %v917_v9  }
  0x42   :  { %83 = vperm.xlu1 %799, %v36_v8  }
  0x44   :  { %396 = vperm.xlu0 %813, %v354_v20  }
  0x46   :  { %800 = vset.pattern.permute.xlu1 %v847_v2 }
  0x47   :  { %172 = vperm.xlu1 %800, %v35_v16  }
  0x48   :  { %103 = vperm.xlu0 %813, %v926_v11  }
  0x4b   :  { %801 = vset.pattern.permute.xlu1 %v846_v1 }
  0x4c   :  { %406 = vperm.xlu0 %813, %v356_v21   ;;  %273 = vperm.xlu1 %801, %v35_v16  }
  0x50   :  { %113 = vperm.xlu0 %813, %v932_v12   ;;  %277 = vperm.xlu1 %801, %v36_v8  }
  0x54   :  { %416 = vperm.xlu0 %813, %v358_v22   ;;  %802 = vset.pattern.permute.xlu1 %v848_v7 }
  0x55   :  { %391 = vperm.xlu1 %802, %v353_v23  }
  0x58   :  { %123 = vperm.xlu0 %813, %v939_v13  }
  0x59   :  { %88 = vperm.xlu1 %802, %v37_v24  }
  0x5c   :  { %426 = vperm.xlu0 %813, %v360_v25  }
  0x5d   :  { %803 = vset.pattern.permute.xlu1 %v847_v2 }
  0x5e   :  { %180 = vperm.xlu1 %803, %v37_v24  }
  0x60   :  { %441 = vperm.xlu0 %813, %v363_v26  }
  0x62   :  { %804 = vset.pattern.permute.xlu1 %v846_v1 }
  0x63   :  { %281 = vperm.xlu1 %804, %v37_v24  }
  0x64   :  { %507 = vperm.xlu0 %813, %v493_v27   ;;  %v492_v27 = vld [vmem:[%s1202_s4] sm:$0xff] }
  0x67   :  { %285 = vperm.xlu1 %804, %v917_v9  }
  0x68   :  { %517 = vperm.xlu0 %813, %v495_v28  }
  0x6b   :  { %805 = vset.pattern.permute.xlu1 %v848_v7 }
  0x6c   :  { %652 = vperm.xlu0 %813, %v638_v29   ;;  %401 = vperm.xlu1 %805, %v355_v30  }
  0x70   :  { %657 = vperm.xlu0 %813, %v639_v31   ;;  %98 = vperm.xlu1 %805, %v39_v32  }
  0x74   :  { %662 = vperm.xlu0 %813, %v640_v33   ;;  %806 = vset.pattern.permute.xlu1 %v847_v2  ;;  %v494_v33 = vld [vmem:[%s1202_s4 + $0x10] sm:$0xff] }
  0x75   :  { %188 = vperm.xlu1 %806, %v39_v32  }
  0x78   :  { %667 = vperm.xlu0 %813, %v641_v34  }
  0x79   :  { %807 = vset.pattern.permute.xlu1 %v846_v1 }
  0x7a   :  { %289 = vperm.xlu1 %807, %v39_v32  }
  0x7c   :  { %672 = vperm.xlu0 %813, %v642_v35  }
  0x7e   :  { %293 = vperm.xlu1 %807, %v926_v11  }
  0x80   :  { %682 = vperm.xlu0 %813, %v644_v36   ;;  %v816_v36 = vld [vmem:[%s1201_s3] sm:$0xff]  }
  0x81   :  { %v149_v38 = vpop.permute.xlu1 %148  ;;  %v250_v39 = vpop.permute.xlu0 %249  ;;  %761 = vmatprep.mubr.bf16.mxu0 %v816_v36 }
  0x82   :  { %808 = vset.pattern.permute.xlu1 %v848_v7  ;;  %v215_v62 = vmul.f32 %v1065_v58, %v149_v38 }
  0x83   :  { %411 = vperm.xlu1 %808, %v357_v37   ;;  %v817_v37 = vld [vmem:[%s1201_s3 + $0x10] sm:$0xff]  }
  0x84   :  { %765 = vmatprep.mubr.bf16.mxu1 %v817_v37 }
  0x85   :  { %v153_v41 = vpop.permute.xlu1 %152  ;;  %v258_v42 = vpop.permute.xlu0 %257 }
  0x86   :  { %v216_v6 = vmul.f32 %v1065_v58, %v153_v41  ;;  %v318_v23 = vmul.f32 %v1080_v0, %v258_v42 }
  0x87   :  { %108 = vperm.xlu1 %808, %v41_v40  }
  0x89   :  { %v1037_v43 = vpop.permute.xlu0 %269 }
  0x8a   :  { %v254_v44 = vpop.permute.xlu1 %253 }
  0x8b   :  { %809 = vset.pattern.permute.xlu1 %v847_v2  ;;  %v317_v14 = vmul.f32 %v1080_v0, %v254_v44 }
  0x8c   :  { %196 = vperm.xlu1 %809, %v41_v40  }
  0x8e   :  { %v1040_v45 = vpop.permute.xlu0 %164 }
  0x8f   :  { %v59_v46 = vpop.permute.xlu1 %58 }
  0x90   :  { %810 = vset.pattern.permute.xlu1 %v846_v1  ;;  %v132_v19 = vmul.f32 %v1072_v60, %v59_v46 }
  0x91   :  { %297 = vperm.xlu1 %810, %v41_v40   ;;  %v637_v40 = vld [vmem:[%s1203_s5] sm:$0xff] }
  0x92   :  { %v1043_v47 = vpop.permute.xlu0 %176 }
  0x94   :  { %v157_v48 = vpop.permute.xlu1 %156 }
  0x95   :  { %301 = vperm.xlu1 %810, %v932_v12   ;;  %v217_v15 = vmul.f32 %v1065_v58, %v157_v48  ;;  %v496_v48 = vld [vmem:[%s1202_s4 + $0x20] sm:$0xff] }
  0x96   :  { %v1046_v49 = vpop.permute.xlu0 %184 }
  0x98   :  { %v161_v51 = vpop.permute.xlu1 %160 }
  0x99   :  { %811 = vset.pattern.permute.xlu1 %v848_v7  ;;  %v218_v24 = vmul.f32 %v1065_v58, %v161_v51  ;;  %v497_v51 = vld [vmem:[%s1202_s4 + $0x28] sm:$0xff] }
  0x9a   :  { %421 = vperm.xlu1 %811, %v359_v50   ;;  %v1052_v52 = vpop.permute.xlu0 %192 }
  0x9d   :  { %v262_v54 = vpop.permute.xlu1 %261 }
  0x9e   :  { %118 = vperm.xlu1 %811, %v43_v53   ;;  %v1057_v55 = vpop.permute.xlu0 %200  ;;  %v319_v31 = vmul.f32 %v1080_v0, %v262_v54  ;;  %v498_v54 = vld [vmem:[%s1202_s4 + $0x30] sm:$0xff] }
  0xa2   :  { %812 = vset.pattern.permute.xlu1 %v847_v2  ;;  %v367_v56 = vpop.permute.xlu1 %366  ;;  %v1060_v57 = vpop.permute.xlu0 %208  ;;  %v316_v2 = vmul.f32 %v1080_v0, %v250_v39 }
  0xa3   :  { %204 = vperm.xlu1 %812, %v43_v53  }
  0xa6   :  { %v1067_v59 = vpop.permute.xlu1 %68 }
  0xa7   :  { %v49_v61 = vpop.permute.xlu0 %48  ;;  %814 = vset.pattern.permute.xlu1 %v846_v1 }
  0xa8   :  { %v130_v63 = vmul.f32 %v1072_v60, %v49_v61  ;;  %305 = vperm.xlu1 %814, %v43_v53   ;;  %v134_v61 = vmul.f32 %v1072_v60, %v1067_v59 }
  0xaa   :  { %v231_v3 = vadd.f32 %v215_v62, %v130_v63  ;;  %v1083_v4 = vpop.permute.xlu1 %73 }
  0xab   :  { %v54_v5 = vpop.permute.xlu0 %53 }
  0xac   :  { %v131_v1 = vmul.f32 %v1072_v60, %v54_v5  ;;  %309 = vperm.xlu1 %814, %v939_v13   ;;  %v332_v8 = vadd.f32 %v316_v2, %v231_v3  ;;  %v362_v13 = vld [vmem:[%s1200_s2 + $0x70] sm:$0xff]  ;;  %v135_v2 = vmul.f32 %v1072_v60, %v1083_v4  ;;  %v499_v5 = vld [vmem:[%s1202_s4 + $0x38] sm:$0xff] }
  0xad   :  { %v643_v4 = vld [vmem:[%s1203_s5 + $0x30] sm:$0xff] }
  0xae   :  { %v232_v9 = vadd.f32 %v216_v6, %v131_v1  ;;  %v444_v17 = vadd.f32 %v367_v56, %v332_v8  ;;  %v219_v56 = vmul.f32 %v1065_v58, %v1040_v45  ;;  %v321_v6 = vmul.f32 %v1080_v0, %v1037_v43 }
  0xaf   :  { %v64_v11 = vpop.permute.xlu0 %63  ;;  %v169_v12 = vpop.permute.xlu1 %168 }
  0xb0   :  { %815 = vset.pattern.permute.xlu1 %v848_v7  ;;  %v333_v16 = vadd.f32 %v317_v14, %v232_v9  ;;  %v133_v20 = vmul.f32 %v1072_v60, %v64_v11  ;;  %v233_v7 = vadd.f32 %v217_v15, %v132_v19  ;;  %v460_v25 = vmax.f32 %v444_v17, 0.0 }
  0xb1   :  { %431 = vperm.xlu1 %815, %v361_v10   ;;  %v220_v62 = vmul.f32 %v1065_v58, %v169_v12  ;;  %v235_v45 = vadd.f32 %v219_v56, %v134_v61 }
  0xb2   :  { %v234_v28 = vadd.f32 %v218_v24, %v133_v20  ;;  %v334_v32 = vadd.f32 %v318_v23, %v233_v7  ;;  %v222_v23 = vmul.f32 %v1065_v58, %v1043_v47 }
  0xb3   :  { %v372_v18 = vpop.permute.xlu0 %371  ;;  %v236_v1 = vadd.f32 %v220_v62, %v135_v2 }
  0xb4   :  { %v445_v21 = vadd.f32 %v372_v18, %v333_v16  ;;  %v266_v22 = vpop.permute.xlu1 %265  ;;  %v335_v35 = vadd.f32 %v319_v31, %v234_v28 }
  0xb5   :  { %436 = vperm.xlu1 %815, %v362_v13   ;;  %v320_v3 = vmul.f32 %v1080_v0, %v266_v22  ;;  %v337_v11 = vadd.f32 %v321_v6, %v236_v1 }
  0xb6   :  { %v461_v26 = vmax.f32 %v445_v21, 0.0 }
  0xb7   :  { %v79_v53 = vpop.permute.xlu0 %78  ;;  %v336_v9 = vadd.f32 %v320_v3, %v235_v45 }
  0xb8   :  { %v484_v29 = vpack.c.bf16 %v461_v26, %v460_v25  ;;  %v136_v18 = vmul.f32 %v1072_v60, %v79_v53 }
  0xb9   :  { %502 = vperm.xlu1 %815, %v492_v27   ;;  %v377_v30 = vpop.permute.xlu1 %376 }
  0xba   :  { %745 = vmatprep.subr.bf16.mxu0 %v484_v29  ;;  %769 = vmatprep.subr.bf16.mxu1 %v484_v29  ;;  %v446_v34 = vadd.f32 %v377_v30, %v334_v32 }
  0xbb   :  { %746 = vmatpush3.bf16.msra.mxu0 %v484_v29  ;;  %777 = vmatpush3.bf16.msra.mxu1 %v484_v29  ;;  %v387_v59 = vpop.permute.xlu0 %386 }
  0xbc   :  { %v462_v41 = vmax.f32 %v446_v34, 0.0  ;;  %v448_v10 = vadd.f32 %v387_v59, %v336_v9 }
  0xbd   :  { %512 = vperm.xlu1 %815, %v494_v33   ;;  %v382_v38 = vpop.permute.xlu1 %381 }
  0xbe   :  { %v447_v39 = vadd.f32 %v382_v38, %v335_v35  ;;  %v464_v15 = vmax.f32 %v448_v10, 0.0  ;;  %v226_v10 = vmul.f32 %v1065_v58, %v1052_v52 }
  0xbf   :  { %v94_v22 = vpop.permute.xlu0 %93 }
  0xc0   :  { %v463_v42 = vmax.f32 %v447_v39, 0.0  ;;  %v224_v39 = vmul.f32 %v1065_v58, %v1046_v49 }
  0xc1   :  { %647 = vperm.xlu1 %815, %v637_v40   ;;  %v84_v44 = vpop.permute.xlu1 %83  ;;  %v139_v40 = vmul.f32 %v1072_v60, %v94_v22 }
  0xc2   :  { %v485_v46 = vpack.c.bf16 %v463_v42, %v462_v41  ;;  %v137_v7 = vmul.f32 %v1072_v60, %v84_v44 }
  0xc3   :  { %v397_v29 = vpop.permute.xlu0 %396 }
  0xc4   :  { %747 = vmatprep.subr.bf16.mxu0 %v485_v46  ;;  %770 = vmatprep.subr.bf16.mxu1 %v485_v46  ;;  %v238_v28 = vadd.f32 %v222_v23, %v137_v7 }
  0xc5   :  { %522 = vperm.xlu1 %815, %v496_v48   ;;  %748 = vmatpush3.bf16.msra.mxu0 %v485_v46 }
  0xc6   :  { %778 = vmatpush3.bf16.msra.mxu1 %v485_v46  ;;  %v173_v50 = vpop.permute.xlu1 %172 }
  0xc7   :  { %v221_v19 = vmul.f32 %v1065_v58, %v173_v50  ;;  %v104_v46 = vpop.permute.xlu0 %103  ;;  %v240_v50 = vadd.f32 %v224_v39, %v139_v40 }
  0xc9   :  { %527 = vperm.xlu1 %815, %v497_v51   ;;  %v237_v24 = vadd.f32 %v221_v19, %v136_v18 }
  0xcb   :  { %v274_v63 = vpop.permute.xlu1 %273  ;;  %v407_v56 = vpop.permute.xlu0 %406 }
  0xcc   :  { %v322_v20 = vmul.f32 %v1080_v0, %v274_v63 }
  0xcd   :  { %532 = vperm.xlu1 %815, %v498_v54  }
  0xce   :  { %v338_v25 = vadd.f32 %v322_v20, %v237_v24 }
  0xcf   :  { %v278_v8 = vpop.permute.xlu1 %277 }
  0xd0   :  { %v323_v26 = vmul.f32 %v1080_v0, %v278_v8  ;;  %v450_v30 = vadd.f32 %v397_v29, %v338_v25 }
  0xd1   :  { %537 = vperm.xlu1 %815, %v499_v5  }
  0xd2   :  { %v339_v31 = vadd.f32 %v323_v26, %v238_v28  ;;  %v466_v34 = vmax.f32 %v450_v30, 0.0  ;;  %v228_v30 = vmul.f32 %v1065_v58, %v1057_v55 }
  0xd4   :  { %v392_v12 = vpop.permute.xlu1 %391 }
  0xd5   :  { %v449_v14 = vadd.f32 %v392_v12, %v337_v11  ;;  %677 = vperm.xlu1 %815, %v643_v4   ;;  %v114_v4 = vpop.permute.xlu0 %113  ;;  %v141_v11 = vmul.f32 %v1072_v60, %v104_v46 }
  0xd7   :  { %v465_v16 = vmax.f32 %v449_v14, 0.0 }
  0xd8   :  { %v89_v17 = vpop.permute.xlu1 %88 }
  0xd9   :  { %v486_v13 = vpack.c.bf16 %v465_v16, %v464_v15  ;;  %v138_v41 = vmul.f32 %v1072_v60, %v89_v17  ;;  %v242_v17 = vadd.f32 %v226_v10, %v141_v11 }
  0xdb   :  { %749 = vmatprep.subr.bf16.mxu0 %v486_v13  ;;  %771 = vmatprep.subr.bf16.mxu1 %v486_v13 }
  0xdc   :  { %750 = vmatpush3.bf16.msra.mxu0 %v486_v13  ;;  %779 = vmatpush3.bf16.msra.mxu1 %v486_v13  ;;  %v417_v13 = vpop.permute.xlu0 %416 }
  0xdd   :  { %v181_v43 = vpop.permute.xlu1 %180 }
  0xde   :  { %v223_v38 = vmul.f32 %v1065_v58, %v181_v43 }
  0xe0   :  { %v239_v48 = vadd.f32 %v223_v38, %v138_v41  ;;  %v124_v25 = vpop.permute.xlu0 %123 }
  0xe2   :  { %v282_v21 = vpop.permute.xlu1 %281 }
  0xe3   :  { %v324_v42 = vmul.f32 %v1080_v0, %v282_v21 }
  0xe5   :  { %v340_v51 = vadd.f32 %v324_v42, %v239_v48 }
  0xe6   :  { %v286_v27 = vpop.permute.xlu1 %285 }
  0xe7   :  { %v325_v53 = vmul.f32 %v1080_v0, %v286_v27  ;;  %v452_v61 = vadd.f32 %v407_v56, %v340_v51 }
  0xe9   :  { %v341_v62 = vadd.f32 %v325_v53, %v240_v50  ;;  %v468_v49 = vmax.f32 %v452_v61, 0.0 }
  0xeb   :  { %v402_v32 = vpop.permute.xlu1 %401 }
  0xec   :  { %v451_v33 = vadd.f32 %v402_v32, %v339_v31  ;;  %v230_v31 = vmul.f32 %v1065_v58, %v1060_v57  ;;  %v143_v32 = vmul.f32 %v1072_v60, %v114_v4 }
  0xee   :  { %v467_v35 = vmax.f32 %v451_v33, 0.0  ;;  %v145_v33 = vmul.f32 %v1072_v60, %v124_v25  ;;  %v244_v38 = vadd.f32 %v228_v30, %v143_v32 }
  0xef   :  { %v99_v36 = vpop.permute.xlu1 %98 }
  0xf0   :  { %v487_v37 = vpack.c.bf16 %v467_v35, %v466_v34  ;;  %v140_v8 = vmul.f32 %v1072_v60, %v99_v36  ;;  %v246_v39 = vadd.f32 %v230_v31, %v145_v33 }
  0xf2   :  { %751 = vmatprep.subr.bf16.mxu0 %v487_v37  ;;  %772 = vmatprep.subr.bf16.mxu1 %v487_v37 }
  0xf3   :  { %752 = vmatpush3.bf16.msra.mxu0 %v487_v37  ;;  %780 = vmatpush3.bf16.msra.mxu1 %v487_v37  ;;  %v427_v37 = vpop.permute.xlu0 %426 }
  0xf4   :  { %v189_v47 = vpop.permute.xlu1 %188 }
  0xf5   :  { %v225_v1 = vmul.f32 %v1065_v58, %v189_v47 }
  0xf7   :  { %v241_v12 = vadd.f32 %v225_v1, %v140_v8  ;;  %v442_v51 = vpop.permute.xlu0 %441 }
  0xf9   :  { %v290_v44 = vpop.permute.xlu1 %289 }
  0xfa   :  { %v326_v59 = vmul.f32 %v1080_v0, %v290_v44 }
  0xfc   :  { %v342_v14 = vadd.f32 %v326_v59, %v241_v12 }
  0xfd   :  { %v294_v54 = vpop.permute.xlu1 %293 }
  0xfe   :  { %v327_v15 = vmul.f32 %v1080_v0, %v294_v54  ;;  %v454_v43 = vadd.f32 %v417_v13, %v342_v14 }
 0x100   :  { %v343_v18 = vadd.f32 %v327_v15, %v242_v17  ;;  %v470_v21 = vmax.f32 %v454_v43, 0.0 }
 0x102   :  { %v412_v63 = vpop.permute.xlu1 %411 }
 0x103   :  { %v453_v2 = vadd.f32 %v412_v63, %v341_v62 }
 0x105   :  { %v469_v3 = vmax.f32 %v453_v2, 0.0 }
 0x106   :  { %v109_v5 = vpop.permute.xlu1 %108 }
 0x107   :  { %v488_v6 = vpack.c.bf16 %v469_v3, %v468_v49  ;;  %v142_v26 = vmul.f32 %v1072_v60, %v109_v5  ;;  %v819_v3 = vld [vmem:[%s1201_s3 + $0x18] sm:$0xff]   ;;  %v508_v5 = vpop.permute.xlu0 %507 }
 0x109   :  { %753 = vmatprep.subr.bf16.mxu0 %v488_v6  ;;  %773 = vmatprep.subr.bf16.mxu1 %v488_v6 }
 0x10a   :  { %754 = vmatpush3.bf16.msra.mxu0 %v488_v6  ;;  %781 = vmatpush3.bf16.msra.mxu1 %v488_v6 }
 0x10b   :  { %v197_v45 = vpop.permute.xlu1 %196 }
 0x10c   :  { %v227_v24 = vmul.f32 %v1065_v58, %v197_v45  ;;  %v518_v45 = vpop.permute.xlu0 %517 }
 0x10e   :  { %v243_v29 = vadd.f32 %v227_v24, %v142_v26 }
 0x110   :  { %v298_v9 = vpop.permute.xlu1 %297  ;;  %v653_v8 = vpop.permute.xlu0 %652 }
 0x111   :  { %v328_v27 = vmul.f32 %v1080_v0, %v298_v9 }
 0x113   :  { %v344_v34 = vadd.f32 %v328_v27, %v243_v29 }
 0x114   :  { %v302_v16 = vpop.permute.xlu1 %301  ;;  %v658_v9 = vpop.permute.xlu0 %657 }
 0x115   :  { %v329_v35 = vmul.f32 %v1080_v0, %v302_v16  ;;  %v456_v41 = vadd.f32 %v427_v37, %v344_v34 }
 0x117   :  { %v345_v44 = vadd.f32 %v329_v35, %v244_v38  ;;  %v472_v54 = vmax.f32 %v456_v41, 0.0 }
 0x118   :  { %v663_v10 = vpop.permute.xlu0 %662 }
 0x119   :  { %v422_v19 = vpop.permute.xlu1 %421 }
 0x11a   :  { %v455_v20 = vadd.f32 %v422_v19, %v343_v18 }
 0x11c   :  { %v471_v22 = vmax.f32 %v455_v20, 0.0  ;;  %v668_v26 = vpop.permute.xlu0 %667 }
 0x11d   :  { %v119_v23 = vpop.permute.xlu1 %118 }
 0x11e   :  { %v489_v7 = vpack.c.bf16 %v471_v22, %v470_v21  ;;  %v144_v55 = vmul.f32 %v1072_v60, %v119_v23 }
 0x120   :  { %755 = vmatprep.subr.bf16.mxu0 %v489_v7  ;;  %774 = vmatprep.subr.bf16.mxu1 %v489_v7 }
 0x121   :  { %756 = vmatpush3.bf16.msra.mxu0 %v489_v7  ;;  %782 = vmatpush3.bf16.msra.mxu1 %v489_v7 }
 0x122   :  { %v205_v52 = vpop.permute.xlu1 %204 }
 0x123   :  { %v229_v40 = vmul.f32 %v1065_v58, %v205_v52 }
 0x125   :  { %v245_v48 = vadd.f32 %v229_v40, %v144_v55 }
 0x127   :  { %v306_v28 = vpop.permute.xlu1 %305 }
 0x128   :  { %v330_v57 = vmul.f32 %v1080_v0, %v306_v28 }
 0x12a   :  { %v346_v61 = vadd.f32 %v330_v57, %v245_v48 }
 0x12b   :  { %v310_v36 = vpop.permute.xlu1 %309 }
 0x12c   :  { %v331_v47 = vmul.f32 %v1080_v0, %v310_v36  ;;  %v818_v0 = vld [vmem:[%s1201_s3 + $0x8] sm:$0xff]  }
 0x12e   :  { %v347_v42 = vadd.f32 %v331_v47, %v246_v39  ;;  %v673_v39 = vpop.permute.xlu0 %672 }
 0x130   :  { %v432_v46 = vpop.permute.xlu1 %431  ;;  %v459_v53 = vadd.f32 %v442_v51, %v347_v42 }
 0x131   :  { %v457_v50 = vadd.f32 %v432_v46, %v345_v44 }
 0x132   :  { %v475_v49 = vmax.f32 %v459_v53, 0.0  ;;  %v683_v51 = vpop.permute.xlu0 %682 }
 0x133   :  { %v473_v56 = vmax.f32 %v457_v50, 0.0 }
 0x134   :  { %v437_v62 = vpop.permute.xlu1 %436 }
 0x135   :  { %v490_v63 = vpack.c.bf16 %v473_v56, %v472_v54  ;;  %v458_v2 = vadd.f32 %v437_v62, %v346_v61 }
 0x137   :  { %v474_v58 = vmax.f32 %v458_v2, 0.0  ;;  %757 = vmatprep.subr.bf16.mxu0 %v490_v63  ;;  %775 = vmatprep.subr.bf16.mxu1 %v490_v63 }
 0x138   :  { %758 = vmatpush3.bf16.msra.mxu0 %v490_v63  ;;  %783 = vmatpush3.bf16.msra.mxu1 %v490_v63  ;;  %v503_v6 = vpop.permute.xlu1 %502 }
 0x139   :  { %v491_v60 = vpack.c.bf16 %v475_v49, %v474_v58  ;;  %v707_v58 = vstv %s1204_s6 }
 0x13b   :  { %759 = vmatprep.subr.bf16.mxu0 %v491_v60  ;;  %776 = vmatprep.subr.bf16.mxu1 %v491_v60 }
 0x13c   :  { %760 = vmatpush3.bf16.msra.mxu0 %v491_v60  ;;  %784 = vmatpush3.bf16.msra.mxu1 %v491_v60  ;;  %v513_v1 = vpop.permute.xlu1 %512 }
 0x13f   :  { %762 = vmatmul.mubr.bf16.vlgmr.msra.gmra.mrb[0].mxu0 %v818_v0  ;;  %766 = vmatmul.mubr.bf16.vlgmr.msra.gmra.mrb[0].mxu1 %v819_v3 }
 0x140   :  { %v648_v59 = vpop.permute.xlu1 %647 }
 0x144   :  { %v523_v4 = vpop.permute.xlu1 %522 }
 0x148   :  { %v528_v11 = vpop.permute.xlu1 %527 }
 0x14c   :  { %v533_v7 = vpop.permute.xlu1 %532 }
 0x150   :  { %v538_v35 = vpop.permute.xlu1 %537 }
 0x154   :  { %v678_v46 = vpop.permute.xlu1 %677 }
 0x212   :  { %v763_v12 = vpop.f32.mrb[0].mxu0  ;;  %v767_v14 = vpop.f32.mrb[0].mxu1 }
 0x213   :  { %v598_v15 = vpop.f32.mrb[1].mxu0  ;;  %v614_v16 = vpop.f32.mrb[1].mxu1  ;;  %v607_v17 = vadd.f32 %v763_v12, %v513_v1  ;;  %v623_v32 = vadd.f32 %v767_v14, %v533_v7 }
 0x214   :  { %v599_v13 = vadd.f32 %v598_v15, %v503_v6  ;;  %v764_v43 = vpop.f32.mrb[2].mxu0  ;;  %v768_v18 = vpop.f32.mrb[2].mxu1  ;;  %v615_v24 = vadd.f32 %v614_v16, %v523_v4 }
 0x215   :  { %v601_v19 = vpop.f32.mrb[3].mxu0  ;;  %v617_v20 = vpop.f32.mrb[3].mxu1  ;;  %v610_v22 = vadd.f32 %v764_v43, %v518_v45  ;;  %v631_v52 = vmax.f32 %v607_v17, 0.0  ;;  %v626_v37 = vadd.f32 %v768_v18, %v538_v35  ;;  %v635_v40 = vmax.f32 %v623_v32, 0.0 }
 0x216   :  { %v629_v21 = vmax.f32 %v599_v13, 0.0  ;;  %v602_v23 = vadd.f32 %v601_v19, %v508_v5  ;;  %v618_v30 = vadd.f32 %v617_v20, %v528_v11  ;;  %v633_v33 = vmax.f32 %v615_v24, 0.0 }
 0x217   :  { %v632_v28 = vmax.f32 %v610_v22, 0.0  ;;  %v687_v31 = vmul.f32 %v658_v9, %v631_v52  ;;  %v636_v57 = vmax.f32 %v626_v37, 0.0  ;;  %v691_v48 = vmul.f32 %v678_v46, %v635_v40 }
 0x218   :  { %v630_v25 = vmax.f32 %v602_v23, 0.0  ;;  %v685_v27 = vmul.f32 %v648_v59, %v629_v21  ;;  %v634_v38 = vmax.f32 %v618_v30, 0.0  ;;  %v689_v41 = vmul.f32 %v668_v26, %v633_v33 }
 0x219   :  { %v688_v36 = vmul.f32 %v663_v10, %v632_v28  ;;  %v692_v53 = vmul.f32 %v683_v51, %v636_v57 }
 0x21a   :  { %v686_v29 = vmul.f32 %v653_v8, %v630_v25  ;;  %v690_v42 = vmul.f32 %v673_v39, %v634_v38 }
 0x21c   :  { %v693_v34 = vadd.f32 %v686_v29, %v685_v27 }
 0x21e   :  { %v694_v47 = vadd.f32 %v693_v34, %v687_v31 }
 0x220   :  { %v695_v55 = vadd.f32 %v694_v47, %v688_v36 }
 0x222   :  { %v696_v44 = vadd.f32 %v695_v55, %v689_v41 }
 0x224   :  { %v697_v50 = vadd.f32 %v696_v44, %v690_v42 }
 0x226   :  { %v698_v54 = vadd.f32 %v697_v50, %v691_v48 }
 0x228   :  { %v699_v56 = vadd.f32 %v698_v54, %v692_v53 }
 0x22a   :  { %v700_v61 = vrot.slane %v699_v56, 4 }
 0x22c   :  { %v701_v62 = vadd.f32 %v700_v61, %v699_v56 }
 0x22e   :  { %v702_v63 = vrot.slane %v701_v62, 2 }
 0x230   :  { %v703_v2 = vadd.f32 %v702_v63, %v701_v62 }
 0x232   :  { %v704_v49 = vrot.slane %v703_v2, 1 }
 0x234   :  { %v705_v60 = vadd.f32 %v704_v49, %v703_v2 }
 0x236   :  { %v708_v0 = vadd.f32 %v707_v58, %v705_v60 }
 0x238   :  { %820 = vtanh.f32 %v708_v0 }
 0x242   :  { %v821_v3 = vpop.eup %820 }
 0x243   :  { %v710_v5 = vmul.f32 2.0, %v821_v3 }
 0x245   :  { %711 = vst [vmem:[#allocation3] sm:$0x1] %v710_v5 }
 0x246   :  { %833 = shalt.err (!%p830_p4)
}
 0x247   :  { %s834_s6 = scalar_lea.hbm %s1205_s7, 16 }
 0x248   :  { %p835_p5 = scmp.ne.s32.totalorder %s1205_s7, %s834_s6  ;;  %p838_p6 = scmp.lt.u32.totalorder %s834_s6, %s1205_s7 }
 0x24a   :  { %p840_p7 = pnand %p838_p6, %p835_p5 }
 0x24c   :  { %843 = shalt.err (!%p840_p7)
}
 0x24d   :  { %721 = dma.vmem_to_hbm [thread:$0]  %s719_s0, 16, %s1205_s7, [#allocation4]  }
 0x24e   :  { %844 = dma.done.wait [#allocation4], 16  }
 0x24f   :  { %845 = vsyncadd [#allocation4], 4294967280 }
 0x250   :  { %725 = vsyncpa [#allocation4], 1 }

</bundles_post_ra>
